<compile_context>
chip_gen: v5e
topology: v5e:2x2
jax: 0.10.0
libtpu: 0.0.40
codegen_flags: <defaults>
</compile_context>

<pallas_src>
import math
import functools

import jax
import jax.numpy as jnp
from jax.experimental import pallas as pl
from jax.experimental.pallas import tpu as pltpu

LANES = 128
SUBLANES = 8
ROW_ALIGN = 16                    # legal sublane multiple for both bf16 and f32 blocks
MAX_TILE_BYTES = 1 << 20          # ~1 MiB of input per tile (per array)


def _round_up(x, m):
    return ((x + m - 1) // m) * m


def _reswan_kernel(pred_ref, true_ref, out_ref, *, auto_iou, valid_in_last,
                   mask_last):
    # Load in native dtype, widen in-register (halves HBM traffic for bf16 inputs).
    p = pred_ref[...].astype(jnp.float32)
    t = true_ref[...].astype(jnp.float32)
    rows, lanes = p.shape

    # Numerically stable BCEWithLogits (reduction='none'), elementwise.
    loss = jnp.maximum(p, 0.0) - p * t + jnp.log1p(jnp.exp(-jnp.abs(p)))

    # Modulating weight: the three PyTorch branches are mutually exclusive and
    # exhaustive, so the sum-of-masked-terms collapses to two nested selects.
    w = jnp.where(
        t <= auto_iou - 0.1,
        jnp.float32(1.0),
        jnp.where(t < auto_iou,
                  jnp.float32(math.exp(auto_iou)),
                  jnp.exp(-(t - 1.0))),
    )
    loss = loss * w

    def block_sum(x):
        # Split the sublane axis along its native (8,128) tiling: pure VPU adds,
        # result stays vreg-shaped (no per-step XLU reduce, no serial scalar acc).
        return jnp.sum(x.reshape(rows // SUBLANES, SUBLANES, lanes), axis=0)

    out_ref[...] = block_sum(loss).reshape(1, SUBLANES, lanes)

    if mask_last:
        # Only the FINAL grid step can contain padded or out-of-bounds elements;
        # overwrite its partial with those contributions zeroed.  Block-local
        # index (< row_tile*128) keeps everything comfortably inside int32.
        @pl.when(pl.program_id(0) == pl.num_programs(0) - 1)
        def _():
            row_idx = jax.lax.broadcasted_iota(jnp.int32, (rows, lanes), 0)
            lane_idx = jax.lax.broadcasted_iota(jnp.int32, (rows, lanes), 1)
            lidx = row_idx * lanes + lane_idx
            masked = jnp.where(lidx < valid_in_last, loss, jnp.float32(0.0))
            out_ref[...] = block_sum(masked).reshape(1, SUBLANES, lanes)


def reswan_loss(pred, true, auto_iou=0.5, reduction="mean"):
    """Pallas TPU implementation of reswanLoss(BCEWithLogitsLoss(reduction))."""
    if auto_iou < 0.2:
        auto_iou = 0.2
    if reduction not in ("mean", "sum"):
        # TODO(synk): reduction='none' (full elementwise output) is not
        # implemented; only 'mean'/'sum' reductions are supported here.
        raise NotImplementedError("reswan_loss kernel supports 'mean' or 'sum'")

    n = pred.size
    itemsize = jnp.dtype(pred.dtype).itemsize

    # Pad only to a 16x128-element boundary (minimal copy; none at all when n is
    # already a multiple of 2048, e.g. typical NCHW feature maps).
    rows_needed = pl.cdiv(n, LANES)
    padded_rows = _round_up(max(rows_needed, ROW_ALIGN), ROW_ALIGN)
    padded_n = padded_rows * LANES
    pad = padded_n - n

    flat_p = pred.reshape(-1)
    flat_t = true.reshape(-1)
    if pad:
        flat_p = jnp.pad(flat_p, (0, pad))
        flat_t = jnp.pad(flat_t, (0, pad))
    pred2 = flat_p.reshape(padded_rows, LANES)   # native dtype, no pre-cast
    true2 = flat_t.reshape(padded_rows, LANES)

    # Dtype-aware tile: ~1 MiB of HBM traffic per input per grid step
    # (2048 rows for f32, 4096 rows for bf16/f16).
    max_rows = _round_up(MAX_TILE_BYTES // (LANES * itemsize), ROW_ALIGN)
    row_tile = min(max_rows, padded_rows)
    num_blocks = pl.cdiv(padded_rows, row_tile)
    if num_blocks == 1 and padded_rows >= 2 * ROW_ALIGN:
        # Ensure >=2 grid steps so both v7x TensorCores get work
        # (harmless on single-TC v5e/v6e).
        row_tile = _round_up(pl.cdiv(padded_rows, 2), ROW_ALIGN)
        num_blocks = pl.cdiv(padded_rows, row_tile)

    block_elems = row_tile * LANES
    covered = num_blocks * block_elems            # includes OOB rows of a partial last block
    mask_last = covered > n
    valid_in_last = n - (num_blocks - 1) * block_elems

    kernel = functools.partial(
        _reswan_kernel,
        auto_iou=float(auto_iou),
        valid_in_last=int(valid_in_last),
        mask_last=bool(mask_last),
    )

    partials = pl.pallas_call(
        kernel,
        out_shape=jax.ShapeDtypeStruct((num_blocks, SUBLANES, LANES), jnp.float32),
        grid_spec=pl.GridSpec(
            grid=(num_blocks,),
            in_specs=[
                pl.BlockSpec((row_tile, LANES), lambda i: (i, 0)),
                pl.BlockSpec((row_tile, LANES), lambda i: (i, 0)),
            ],
            out_specs=pl.BlockSpec((1, SUBLANES, LANES), lambda i: (i, 0, 0)),
        ),
        compiler_params=pltpu.CompilerParams(
            dimension_semantics=("parallel",),
            vmem_limit_bytes=32 * 1024 * 1024,
        ),
    )(pred2, true2)

    total = jnp.sum(partials)
    if reduction == "mean":
        return total / jnp.float32(n)
    return total


def _reference(pred, true, auto_iou=0.5):
    """Pure-JAX reference mirroring the PyTorch module (reduction='mean')."""
    if auto_iou < 0.2:
        auto_iou = 0.2
    p = pred.astype(jnp.float32)
    t = true.astype(jnp.float32)
    loss = jnp.maximum(p, 0.0) - p * t + jnp.log1p(jnp.exp(-jnp.abs(p)))
    b1 = (t <= auto_iou - 0.1).astype(jnp.float32)
    b2 = jnp.logical_and(t > auto_iou - 0.1, t < auto_iou).astype(jnp.float32)
    b3 = (t >= auto_iou).astype(jnp.float32)
    w = 1.0 * b1 + math.exp(auto_iou) * b2 + jnp.exp(-(t - 1.0)) * b3
    return jnp.mean(loss * w)


if __name__ == "__main__":
    key = jax.random.PRNGKey(0)
    k1, k2, k3, k4 = jax.random.split(key, 4)

    # NCHW inputs: batch=2, channels=4, spatial=16x16 -> 2048 elements (no padding).
    pred = jax.random.normal(k1, (2, 4, 16, 16), dtype=jnp.float32)
    true = jax.random.uniform(k2, (2, 4, 16, 16), dtype=jnp.float32)
    out = jax.block_until_ready(reswan_loss(pred, true, auto_iou=0.5))
    ref = _reference(pred, true, auto_iou=0.5)
    assert jnp.allclose(out, ref, rtol=1e-5, atol=1e-6), (out, ref)

    # Ragged shape (exercises minimal padding + the last-block mask) with bf16
    # inputs (exercises native-dtype transport + in-register widening).
    pred_b = jax.random.normal(k3, (3, 5, 7, 11), dtype=jnp.bfloat16)
    true_b = jax.random.uniform(k4, (3, 5, 7, 11), dtype=jnp.bfloat16)
    out_b = jax.block_until_ready(reswan_loss(pred_b, true_b, auto_iou=0.5))
    ref_b = _reference(pred_b, true_b, auto_iou=0.5)
    assert jnp.allclose(out_b, ref_b, rtol=1e-5, atol=1e-5), (out_b, ref_b)

    print("KERNEL_OK")
</pallas_src>

<mosaic_0001>
module attributes {stable_mosaic.version = 11 : i64} {
  func.func @_reswan_kernel(%arg0: i32, %arg1: memref<16x128xf32, #tpu.memory_space<vmem>>, %arg2: memref<16x128xf32, #tpu.memory_space<vmem>>, %arg3: memref<1x8x128xf32, #tpu.memory_space<vmem>>) attributes {dimension_semantics = [#tpu.dimension_semantics<parallel>], iteration_bounds = array<i64: 1>, scalar_prefetch = 0 : i64, scratch_operands = 0 : i64, tpu.core_type = #tpu.core_type<tc>, window_params = [{transform_indices = @transform_0, window_bounds = array<i64: 16, 128>}, {transform_indices = @transform_1, window_bounds = array<i64: 16, 128>}, {transform_indices = @transform_2, window_bounds = array<i64: 1, 8, 128>}]} {
    %c0 = arith.constant 0 : index
    %c0_0 = arith.constant 0 : index
    %0 = vector.load %arg1[%c0, %c0_0] : memref<16x128xf32, #tpu.memory_space<vmem>>, vector<16x128xf32>
    %c0_1 = arith.constant 0 : index
    %c0_2 = arith.constant 0 : index
    %1 = vector.load %arg2[%c0_1, %c0_2] : memref<16x128xf32, #tpu.memory_space<vmem>>, vector<16x128xf32>
    %cst = arith.constant 0.000000e+00 : f32
    %2 = vector.broadcast %cst : f32 to vector<16x128xf32>
    %3 = arith.maximumf %0, %2 : vector<16x128xf32>
    %4 = arith.mulf %0, %1 : vector<16x128xf32>
    %5 = arith.subf %3, %4 : vector<16x128xf32>
    %6 = math.absf %0 : vector<16x128xf32>
    %cst_3 = arith.constant 0.000000e+00 : f32
    %7 = vector.broadcast %cst_3 : f32 to vector<16x128xf32>
    %8 = arith.subf %7, %6 : vector<16x128xf32>
    %9 = math.exp %8 : vector<16x128xf32>
    %10 = math.log1p %9 : vector<16x128xf32>
    %11 = arith.addf %5, %10 : vector<16x128xf32>
    %cst_4 = arith.constant 4.000000e-01 : f32
    %12 = vector.broadcast %cst_4 : f32 to vector<16x128xf32>
    %13 = arith.cmpf ole, %1, %12 : vector<16x128xf32>
    %cst_5 = arith.constant 5.000000e-01 : f32
    %14 = vector.broadcast %cst_5 : f32 to vector<16x128xf32>
    %15 = arith.cmpf olt, %1, %14 : vector<16x128xf32>
    %cst_6 = arith.constant 1.000000e+00 : f32
    %16 = vector.broadcast %cst_6 : f32 to vector<16x128xf32>
    %17 = arith.subf %1, %16 : vector<16x128xf32>
    %cst_7 = arith.constant 0.000000e+00 : f32
    %18 = vector.broadcast %cst_7 : f32 to vector<16x128xf32>
    %19 = arith.subf %18, %17 : vector<16x128xf32>
    %20 = math.exp %19 : vector<16x128xf32>
    %cst_8 = arith.constant 1.64872122 : f32
    %21 = vector.broadcast %cst_8 : f32 to vector<16x128xf32>
    %22 = arith.select %15, %21, %20 : vector<16x128xi1>, vector<16x128xf32>
    %cst_9 = arith.constant 1.000000e+00 : f32
    %23 = vector.broadcast %cst_9 : f32 to vector<16x128xf32>
    %24 = arith.select %13, %23, %22 : vector<16x128xi1>, vector<16x128xf32>
    %25 = arith.mulf %11, %24 : vector<16x128xf32>
    %26 = vector.shape_cast %25 : vector<16x128xf32> to vector<2x8x128xf32>
    %cst_10 = arith.constant dense<0.000000e+00> : vector<8x128xf32>
    %27 = vector.multi_reduction <add>, %26, %cst_10 [0] : vector<2x8x128xf32> to vector<8x128xf32>
    %28 = vector.shape_cast %27 : vector<8x128xf32> to vector<1x8x128xf32>
    %c0_11 = arith.constant 0 : index
    %c0_12 = arith.constant 0 : index
    %c0_13 = arith.constant 0 : index
    %29 = vector.load %arg3[%c0_11, %c0_12, %c0_13] : memref<1x8x128xf32, #tpu.memory_space<vmem>>, vector<1x8x128xf32>
    tpu.vector_store %arg3[%c0_11, %c0_12, %c0_13], %28 {strides = array<i32>} : memref<1x8x128xf32, #tpu.memory_space<vmem>>, vector<1x8x128xf32>,
    return
  }
  func.func @transform_0(%arg0: i32) -> (i32, i32) {
    %c0_i32 = arith.constant 0 : i32
    %c0_i32_0 = arith.constant 0 : i32
    return %arg0, %c0_i32 : i32, i32
  }
  func.func @transform_1(%arg0: i32) -> (i32, i32) {
    %c0_i32 = arith.constant 0 : i32
    %c0_i32_0 = arith.constant 0 : i32
    return %arg0, %c0_i32 : i32, i32
  }
  func.func @transform_2(%arg0: i32) -> (i32, i32, i32) {
    %c0_i32 = arith.constant 0 : i32
    %c0_i32_0 = arith.constant 0 : i32
    %c0_i32_1 = arith.constant 0 : i32
    return %arg0, %c0_i32, %c0_i32_0 : i32, i32, i32
  }
}

</mosaic_0001>

<bundles_post_ra>
// kernel: tpu_custom_call.1
= control target key start
LH: loop header
LB: loop body
LE: loop exit
PB: predicated region body
PF: predicated region fallthrough
CT: control target
= control target key end

     0   :  { %7 = vsyncpa [#allocation3], 0  ;;  %s247_s0 = inlined_call_operand.hbm [shape: f32[16,128], index: 0, kind: input, shape index: {}]   ;;  %s248_s1 = inlined_call_operand.hbm [shape: f32[16,128], index: 1, kind: input, shape index: {}]   ;;  %s249_s2 = inlined_call_operand.hbm [shape: f32[1,8,128], index: 2, kind: output, shape index: {}]  }
   0x1   :  { %8 = vsyncpa [#allocation6], 0 }
   0x2   :  { %9 = vsyncpa [#allocation4], 0  ;;  %s14_s11 = sshll.u32 %s247_s0, 4  ;;  %s217_s12 = smov [#allocation2]   ;;  %s15_s11 = int_to_ptr.hbm [resolvable:$true] %s14_s11 }
   0x3   :  { %s16_s13 = sshll.u32 %s217_s12, 4  ;;  %s27_s16 = sshll.u32 %s248_s1, 4  ;;  %s17_s13 = int_to_ptr.vmem [resolvable:$true] %s16_s13  ;;  %s28_s16 = int_to_ptr.hbm [resolvable:$true] %s27_s16 }
   0x4   :  { %s218_s17 = smov 128   ;;  %s219_s18 = smov 8  }
   0x5   :  { %22 = dma.hbm_to_vmem [thread:$0]  %s15_s11, 256, %s17_s13, [#allocation3], %s218_s17, %s218_s17, %s219_s18  }
   0x6   :  { %s220_s19 = smov [#allocation5]  }
   0x7   :  { %s29_s20 = sshll.u32 %s220_s19, 4  ;;  %s30_s20 = int_to_ptr.vmem [resolvable:$true] %s29_s20 }
   0x8   :  { %35 = dma.hbm_to_vmem [thread:$0]  %s28_s16, 256, %s30_s20, [#allocation6], %s218_s17, %s218_s17, %s219_s18  }
   0x9   :  { %211 = dma.done.wait [#allocation3], 256  }
   0xa   :  { %212 = vsyncadd [#allocation3], 4294967040 }
   0xb   :  { %213 = dma.done.wait [#allocation6], 256  }
   0xc   :  { %214 = vsyncadd [#allocation6], 4294967040  ;;  %v44_v0 = vld [vmem:[#allocation2] sm:$0xff]  ;;  %v45_v1 = vld [vmem:[#allocation2 + $0x8] sm:$0xff]  ;;  %s221_s0 = smov [#allocation7]   ;;  %s109_s23 = sshll.u32 %s249_s2, 4  ;;  %s110_s23 = int_to_ptr.hbm [resolvable:$true] %s109_s23 }
   0xd   :  { %v46_v2 = vld [vmem:[#allocation5] sm:$0xff]  ;;  %v47_v3 = vld [vmem:[#allocation5 + $0x8] sm:$0xff]  ;;  %v54_v4 = vand.u32 2147483647, %v44_v0  ;;  %v55_v5 = vand.u32 2147483647, %v45_v1 }
   0xe   :  { %v120_v8 = vadd.f32 -1.0, %v46_v2  ;;  %v121_v9 = vadd.f32 -1.0, %v47_v3  ;;  %v48_v23 = vmax.f32 %v44_v0, 0.0  ;;  %v50_v24 = vmul.f32 %v46_v2, %v44_v0  ;;  %s107_s1 = sshll.u32 %s221_s0, 4  ;;  %s108_s1 = int_to_ptr.vmem [resolvable:$true] %s107_s1 }
   0xf   :  { %v56_v6 = vsub.f32 0.0, %v54_v4  ;;  %v57_v7 = vsub.f32 0.0, %v55_v5  ;;  %v49_v28 = vmax.f32 %v45_v1, 0.0  ;;  %v51_v29 = vmul.f32 %v47_v3, %v45_v1 }
  0x10   :  { %v88_v12 = vsub.f32 0.0, %v120_v8  ;;  %v89_v13 = vsub.f32 0.0, %v121_v9  ;;  %vm84_vm0 = vcmp.lt.f32.partialorder %v46_v2, 0.5  ;;  %vm85_vm1 = vcmp.lt.f32.partialorder %v47_v3, 0.5 }
  0x11   :  { %v58_v10 = vmul.f32 1.442695, %v56_v6  ;;  %v60_v11 = vmul.f32 1.442695, %v57_v7  ;;  %vm82_vm2 = vcmp.le.f32.partialorder %v46_v2, 0.4  ;;  %v52_v34 = vsub.f32 %v48_v23, %v50_v24 }
  0x12   :  { %v90_v14 = vmul.f32 1.442695, %v88_v12  ;;  %v92_v15 = vmul.f32 1.442695, %v89_v13  ;;  %vm83_vm3 = vcmp.le.f32.partialorder %v47_v3, 0.4  ;;  %v53_v38 = vsub.f32 %v49_v28, %v51_v29 }
  0x13   :  { %127 = vpow2.f32 %v58_v10 }
  0x14   :  { %129 = vpow2.f32 %v60_v11 }
  0x15   :  { %131 = vpow2.f32 %v90_v14 }
  0x16   :  { %133 = vpow2.f32 %v92_v15 }
  0x19   :  { %v128_v16 = vpop.eup %127 }
  0x1a   :  { %v130_v17 = vpop.eup %129  ;;  %v62_v18 = vadd.f32 1.0, %v128_v16  ;;  %v65_v19 = vmul.f32 -0.5, %v128_v16  ;;  %v68_v25 = vand.u32 2147483647, %v128_v16 }
  0x1b   :  { %v71_v20 = vadd.f32 1.0, %v130_v17  ;;  %v74_v21 = vmul.f32 -0.5, %v130_v17  ;;  %v132_v27 = vpop.eup %131  ;;  %v77_v30 = vand.u32 2147483647, %v130_v17 }
  0x1c   :  { %135 = vlog2.f32 %v62_v18  ;;  %v66_v22 = vadd.f32 1.0, %v65_v19  ;;  %v134_v31 = vpop.eup %133  ;;  %vm69_vm4 = vcmp.lt.f32.partialorder %v68_v25, 0.0004427343  ;;  %v94_v36 = vsel %vm84_vm0, 1.6487212, %v132_v27 }
  0x1d   :  { %137 = vlog2.f32 %v71_v20  ;;  %v75_v26 = vadd.f32 1.0, %v74_v21  ;;  %vm78_vm5 = vcmp.lt.f32.partialorder %v77_v30, 0.0004427343  ;;  %v95_v40 = vsel %vm85_vm1, 1.6487212, %v134_v31 }
  0x1e   :  { %v67_v32 = vmul.f32 %v128_v16, %v66_v22  ;;  %v96_v43 = vsel %vm82_vm2, 1.0, %v94_v36  ;;  %v97_v46 = vsel %vm83_vm3, 1.0, %v95_v40 }
  0x1f   :  { %v76_v35 = vmul.f32 %v130_v17, %v75_v26 }
  0x22   :  { %v136_v33 = vpop.eup %135 }
  0x23   :  { %v138_v37 = vpop.eup %137  ;;  %v64_v39 = vmul.f32 0.6931472, %v136_v33 }
  0x24   :  { %v73_v41 = vmul.f32 0.6931472, %v138_v37 }
  0x25   :  { %v70_v42 = vsel %vm69_vm4, %v67_v32, %v64_v39 }
  0x26   :  { %v79_v44 = vsel %vm78_vm5, %v76_v35, %v73_v41  ;;  %v80_v45 = vadd.f32 %v70_v42, %v52_v34 }
  0x27   :  { %v81_v47 = vadd.f32 %v79_v44, %v53_v38 }
  0x28   :  { %v98_v48 = vmul.f32 %v96_v43, %v80_v45 }
  0x29   :  { %v99_v49 = vmul.f32 %v97_v46, %v81_v47 }
  0x2b   :  { %v100_v50 = vadd.f32 %v99_v49, %v98_v48 }
  0x2d   :  { %101 = vst [vmem:[#allocation7] sm:$0xff] %v100_v50 }
  0x2e   :  { %112 = dma.vmem_to_hbm [thread:$0]  %s108_s1, 128, %s110_s23, [#allocation4]  }
  0x2f   :  { %215 = dma.done.wait [#allocation4], 128  }
  0x30   :  { %216 = vsyncadd [#allocation4], 4294967168 }
  0x31   :  { %117 = vsyncpa [#allocation3], 1 }
  0x32   :  { %118 = vsyncpa [#allocation6], 1 }
  0x33   :  { %119 = vsyncpa [#allocation4], 1 }

</bundles_post_ra>
